<compile_context>
chip_gen: v7x
topology: tpu7x:2x2x1
jax: 0.10.0
libtpu: 0.0.40
codegen_flags: <defaults>
</compile_context>

<pallas_src>
import jax
import jax.numpy as jnp
from jax.experimental import pallas as pl
from jax.experimental.pallas import tpu as pltpu


def _round_up(x, m):
    return -(-x // m) * m


def _fused_layout(state_dim, action_dim, hid_shape):
    """Row/lane layout of the packed, *transposed* parameter buffer.

    Weights are stored as fused W_l^T (twin nets packed side-by-side /
    block-diagonally), so the kernel computes h_l^T = W_l^T @ h_{l-1}^T with
    the batch in the lane dimension.  Each layer has an 8-row-aligned weight
    section (rows = fused out_dim, lanes = fused in_dim) and an 8-row-aligned
    bias section storing the bias as an (n, 1) column at lane 0.
    """
    in_dims = [state_dim + action_dim] + [2 * h for h in hid_shape]   # fused K
    out_dims = [2 * h for h in hid_shape] + [2]                       # fused N
    lane = _round_up(max(in_dims), 128)
    w_rows, b_rows = [], []
    off = 0
    for n in out_dims:
        w_rows.append(off)
        off += _round_up(n, 8)
        b_rows.append(off)
        off += _round_up(n, 8)
    total_rows = _round_up(off, 8)
    return dict(in_dims=in_dims, out_dims=out_dims, lane=lane,
                w_rows=w_rows, b_rows=b_rows, total_rows=total_rows)


def init_qcritic_params(key, state_dim, action_dim, hid_shape):
    """Deterministic synthetic init matching the nn.Linear shapes of QCritic."""
    layers = [state_dim + action_dim] + list(hid_shape) + [1]
    params = []
    for _ in range(2):  # Q_1 and Q_2
        for j in range(len(layers) - 1):
            key, kw, kb = jax.random.split(key, 3)
            fan_in, fan_out = layers[j], layers[j + 1]
            bound = 1.0 / jnp.sqrt(fan_in)
            w = jax.random.uniform(kw, (fan_in, fan_out), jnp.float32, -bound, bound)
            b = jax.random.uniform(kb, (1, fan_out), jnp.float32, -bound, bound)
            params += [w, b]
    return tuple(params)


def pack_qcritic_params(params, state_dim, action_dim, hid_shape,
                        dtype=jnp.bfloat16):
    """Pack the 12 per-layer params into one fused, transposed, aligned buffer.

    dtype=bfloat16 is the default matmul-operand dtype (f32 accumulation in
    the kernel); pass jnp.float32 for bit-accurate f32 math.
    """
    lay = _fused_layout(state_dim, action_dim, hid_shape)
    n_layers = len(lay["out_dims"])
    per = 2 * n_layers
    net_a, net_b = params[:per], params[per:]

    buf = jnp.zeros((lay["total_rows"], lay["lane"]), jnp.float32)
    for l in range(n_layers):
        wa, ba = net_a[2 * l], net_a[2 * l + 1]
        wb, bb = net_b[2 * l], net_b[2 * l + 1]
        if l == 0:
            # Fused layer 0: [w1a | w1b]^T  ->  (2*h1, D_in)
            wt = jnp.concatenate([wa, wb], axis=1).T
        else:
            # Block-diagonal twin fusion, transposed:  (2n, 2k)
            ka, na = wa.shape
            kb, nb = wb.shape
            wt = jnp.concatenate([
                jnp.concatenate([wa.T, jnp.zeros((na, kb), jnp.float32)], axis=1),
                jnp.concatenate([jnp.zeros((nb, ka), jnp.float32), wb.T], axis=1),
            ], axis=0)
        bt = jnp.concatenate([ba, bb], axis=1).T            # (2n, 1) column
        k, n = lay["in_dims"][l], lay["out_dims"][l]
        wr, br = lay["w_rows"][l], lay["b_rows"][l]
        buf = buf.at[wr:wr + n, :k].set(wt)
        buf = buf.at[br:br + n, 0:1].set(bt)
    return buf.astype(dtype)


def _make_qcritic_kernel(state_dim, action_dim, hid_shape, compute_dtype):
    lay = _fused_layout(state_dim, action_dim, hid_shape)
    in_dims, out_dims = lay["in_dims"], lay["out_dims"]
    w_rows, b_rows = lay["w_rows"], lay["b_rows"]
    n_layers = len(out_dims)

    def kernel(x_ref, p_ref, out_ref):
        # x_ref:  (K0, tb)  fused [state|action]^T block (batch in lanes)
        # p_ref:  (rows, lane) packed transposed weights/biases (VMEM-resident)
        # out_ref:(2, tb)   lane-dense fused [q1; q2] output
        h = x_ref[...]
        for l in range(n_layers):
            k, n = in_dims[l], out_dims[l]
            wr, br = w_rows[l], b_rows[l]
            w = p_ref[wr:wr + n, 0:k]                        # (n, k)
            b = p_ref[br:br + n, 0:1].astype(jnp.float32)    # (n, 1)
            # MXU: bf16 (or f32) operands, f32 accumulation.
            y = jnp.dot(w, h, preferred_element_type=jnp.float32) + b
            if l < n_layers - 1:
                # Bias + ReLU in f32 (v5e-safe VPU), cast back for next dot.
                h = jnp.maximum(y, 0.0).astype(compute_dtype)
            else:
                out_ref[...] = y                             # f32 (2, tb)

    return kernel


def _pick_tile(B, block_b):
    """Batch (lane) tile: whole batch when small, else a 128-multiple tile
    capped at block_b, aiming for >= 2 grid steps (v7x megacore)."""
    if B <= 256:
        return B
    tb = _round_up(-(-B // 2), 128)
    return int(min(block_b, tb))


def qcritic_forward_fused(sa_t, packed, state_dim, action_dim, hid_shape,
                          *, block_b=1024):
    """Fast path: takes the feature-major [state|action]^T slab (K0, B) and the
    packed parameter buffer; returns the fused Q output of shape (2, B), f32
    (row 0 = Q_1, row 1 = Q_2)."""
    lay = _fused_layout(state_dim, action_dim, hid_shape)
    K0, B = sa_t.shape
    assert K0 == state_dim + action_dim
    assert packed.shape == (lay["total_rows"], lay["lane"])

    compute_dtype = packed.dtype
    sa_t = sa_t.astype(compute_dtype)

    tb = _pick_tile(B, block_b)
    grid = (pl.cdiv(B, tb),)

    flops = 2 * B * sum(k * n for k, n in zip(lay["in_dims"], lay["out_dims"]))
    bytes_accessed = (sa_t.size * sa_t.dtype.itemsize
                      + packed.size * packed.dtype.itemsize
                      + 2 * B * 4)

    kernel = _make_qcritic_kernel(state_dim, action_dim, hid_shape, compute_dtype)
    out = pl.pallas_call(
        kernel,
        out_shape=jax.ShapeDtypeStruct((2, B), jnp.float32),
        grid=grid,
        in_specs=[
            pl.BlockSpec((K0, tb), lambda i: (0, i)),          # batch in lanes
            pl.BlockSpec(packed.shape, lambda i: (0, 0)),      # weights resident
        ],
        out_specs=pl.BlockSpec((2, tb), lambda i: (0, i)),     # lane-dense out
        compiler_params=pltpu.CompilerParams(
            dimension_semantics=("parallel",),
        ),
        cost_estimate=pl.CostEstimate(
            flops=flops, transcendentals=0, bytes_accessed=bytes_accessed),
    )(sa_t, packed)
    return out


def qcritic_forward(state, action, packed, state_dim, action_dim, hid_shape,
                    *, block_b=1024):
    """torch-API-compatible wrapper: returns (q1, q2), each (B, 1).

    The concat + transpose into the batch-in-lanes layout is one fused wrapper
    op; training loops should ideally keep the replay buffer feature-major and
    call qcritic_forward_fused directly (and index the fused (2, B) result).
    """
    sa_t = jnp.concatenate([state.astype(jnp.float32),
                            action.astype(jnp.float32)], axis=1).T
    q = qcritic_forward_fused(sa_t, packed, state_dim, action_dim, hid_shape,
                              block_b=block_b)
    return q[0:1, :].T, q[1:2, :].T


def _reference_forward(state, action, params):
    sa = jnp.concatenate([state, action], axis=1).astype(jnp.float32)
    (w1a, b1a, w2a, b2a, w3a, b3a,
     w1b, b1b, w2b, b2b, w3b, b3b) = params

    def mlp(x, w1, b1, w2, b2, w3, b3):
        h = jnp.maximum(x @ w1 + b1, 0.0)
        h = jnp.maximum(h @ w2 + b2, 0.0)
        return h @ w3 + b3

    return (mlp(sa, w1a, b1a, w2a, b2a, w3a, b3a),
            mlp(sa, w1b, b1b, w2b, b2b, w3b, b3b))


if __name__ == "__main__":
    state_dim, action_dim = 12, 4
    hid_shape = (32, 32)
    batch = 8

    key = jax.random.PRNGKey(0)
    k_state, k_action, k_params = jax.random.split(key, 3)

    state = jax.random.normal(k_state, (batch, state_dim), jnp.float32)
    action = jax.random.normal(k_action, (batch, action_dim), jnp.float32)
    params = init_qcritic_params(k_params, state_dim, action_dim, hid_shape)

    r1, r2 = _reference_forward(state, action, params)

    # f32-packed path: bit-tight check against the pure-JAX reference.
    packed_f32 = pack_qcritic_params(params, state_dim, action_dim, hid_shape,
                                     dtype=jnp.float32)
    q1, q2 = qcritic_forward(state, action, packed_f32,
                             state_dim, action_dim, hid_shape)
    q1 = jax.block_until_ready(q1)
    q2 = jax.block_until_ready(q2)
    assert q1.shape == (batch, 1) and q2.shape == (batch, 1)
    assert jnp.allclose(q1, r1, atol=1e-5, rtol=1e-5)
    assert jnp.allclose(q2, r2, atol=1e-5, rtol=1e-5)

    # bf16-operand path (default for v6e/v7x): fused output, loose tolerance.
    packed_bf16 = pack_qcritic_params(params, state_dim, action_dim, hid_shape,
                                      dtype=jnp.bfloat16)
    sa_t = jnp.concatenate([state, action], axis=1).T       # (16, B) feature-major
    q = jax.block_until_ready(
        qcritic_forward_fused(sa_t, packed_bf16,
                              state_dim, action_dim, hid_shape))
    assert q.shape == (2, batch) and q.dtype == jnp.float32
    assert jnp.allclose(q[0], r1[:, 0], atol=5e-2, rtol=5e-2)
    assert jnp.allclose(q[1], r2[:, 0], atol=5e-2, rtol=5e-2)

    print("KERNEL_OK")
</pallas_src>

<mosaic_0001>
module attributes {stable_mosaic.version = 11 : i64} {
  func.func @kernel(%arg0: i32, %arg1: memref<16x8xf32, #tpu.memory_space<vmem>>, %arg2: memref<272x128xf32, #tpu.memory_space<vmem>>, %arg3: memref<2x8xf32, #tpu.memory_space<vmem>>) attributes {dimension_semantics = [#tpu.dimension_semantics<parallel>], iteration_bounds = array<i64: 1>, scalar_prefetch = 0 : i64, scratch_operands = 0 : i64, tpu.core_type = #tpu.core_type<tc>, window_params = [{transform_indices = @transform_0, window_bounds = array<i64: 16, 8>}, {pipeline_mode = #tpu.pipeline_mode<synchronous>, transform_indices = @transform_1, window_bounds = array<i64: 272, 128>}, {transform_indices = @transform_2, window_bounds = array<i64: 2, 8>}]} {
    %c0 = arith.constant 0 : index
    %c0_0 = arith.constant 0 : index
    %0 = vector.load %arg1[%c0, %c0_0] : memref<16x8xf32, #tpu.memory_space<vmem>>, vector<16x8xf32>
    %c0_1 = arith.constant 0 : index
    %c0_2 = arith.constant 0 : index
    %1 = vector.load %arg2[%c0_1, %c0_2] : memref<272x128xf32, #tpu.memory_space<vmem>>, vector<64x16xf32>
    %c64 = arith.constant 64 : index
    %c0_3 = arith.constant 0 : index
    %2 = vector.load %arg2[%c64, %c0_3] : memref<272x128xf32, #tpu.memory_space<vmem>>, vector<64x1xf32>
    %cst = arith.constant dense<0.000000e+00> : vector<64x8xf32>
    %3 = tpu.matmul %1, %0, %cst {dimension_numbers = #tpu.dot_dimension_numbers<[1], [0], [0], [1], [0, 0, 1, 1], [], []>} : vector<64x16xf32>, vector<16x8xf32>, vector<64x8xf32> -> vector<64x8xf32>
    %4 = vector.broadcast %2 : vector<64x1xf32> to vector<64x8xf32>
    %5 = arith.addf %3, %4 : vector<64x8xf32>
    %cst_4 = arith.constant 0.000000e+00 : f32
    %6 = vector.broadcast %cst_4 : f32 to vector<64x8xf32>
    %7 = arith.maximumf %5, %6 : vector<64x8xf32>
    %c128 = arith.constant 128 : index
    %c0_5 = arith.constant 0 : index
    %8 = vector.load %arg2[%c128, %c0_5] : memref<272x128xf32, #tpu.memory_space<vmem>>, vector<64x64xf32>
    %c192 = arith.constant 192 : index
    %c0_6 = arith.constant 0 : index
    %9 = vector.load %arg2[%c192, %c0_6] : memref<272x128xf32, #tpu.memory_space<vmem>>, vector<64x1xf32>
    %cst_7 = arith.constant dense<0.000000e+00> : vector<64x8xf32>
    %10 = tpu.matmul %8, %7, %cst_7 {dimension_numbers = #tpu.dot_dimension_numbers<[1], [0], [0], [1], [0, 0, 1, 1], [], []>} : vector<64x64xf32>, vector<64x8xf32>, vector<64x8xf32> -> vector<64x8xf32>
    %11 = vector.broadcast %9 : vector<64x1xf32> to vector<64x8xf32>
    %12 = arith.addf %10, %11 : vector<64x8xf32>
    %cst_8 = arith.constant 0.000000e+00 : f32
    %13 = vector.broadcast %cst_8 : f32 to vector<64x8xf32>
    %14 = arith.maximumf %12, %13 : vector<64x8xf32>
    %c256 = arith.constant 256 : index
    %c0_9 = arith.constant 0 : index
    %15 = vector.load %arg2[%c256, %c0_9] : memref<272x128xf32, #tpu.memory_space<vmem>>, vector<2x64xf32>
    %c264 = arith.constant 264 : index
    %c0_10 = arith.constant 0 : index
    %16 = vector.load %arg2[%c264, %c0_10] : memref<272x128xf32, #tpu.memory_space<vmem>>, vector<2x1xf32>
    %cst_11 = arith.constant dense<0.000000e+00> : vector<2x8xf32>
    %17 = tpu.matmul %15, %14, %cst_11 {dimension_numbers = #tpu.dot_dimension_numbers<[1], [0], [0], [1], [0, 0, 1, 1], [], []>} : vector<2x64xf32>, vector<64x8xf32>, vector<2x8xf32> -> vector<2x8xf32>
    %18 = vector.broadcast %16 : vector<2x1xf32> to vector<2x8xf32>
    %19 = arith.addf %17, %18 : vector<2x8xf32>
    %c0_12 = arith.constant 0 : index
    %c0_13 = arith.constant 0 : index
    %20 = vector.load %arg3[%c0_12, %c0_13] : memref<2x8xf32, #tpu.memory_space<vmem>>, vector<2x8xf32>
    tpu.vector_store %arg3[%c0_12, %c0_13], %19 {strides = array<i32>} : memref<2x8xf32, #tpu.memory_space<vmem>>, vector<2x8xf32>,
    return
  }
  func.func @transform_0(%arg0: i32) -> (i32, i32) {
    %c0_i32 = arith.constant 0 : i32
    %c0_i32_0 = arith.constant 0 : i32
    return %c0_i32, %arg0 : i32, i32
  }
  func.func @transform_1(%arg0: i32) -> (i32, i32) {
    %c0_i32 = arith.constant 0 : i32
    %c0_i32_0 = arith.constant 0 : i32
    %c0_i32_1 = arith.constant 0 : i32
    return %c0_i32, %c0_i32_0 : i32, i32
  }
  func.func @transform_2(%arg0: i32) -> (i32, i32) {
    %c0_i32 = arith.constant 0 : i32
    %c0_i32_0 = arith.constant 0 : i32
    return %c0_i32, %arg0 : i32, i32
  }
}

</mosaic_0001>

<bundles_post_ra>
// kernel: tpu_custom_call.1
= control target key start
LH: loop header
LB: loop body
LE: loop exit
PB: predicated region body
PF: predicated region fallthrough
CT: control target
= control target key end

     0   :  { %7 = vsyncpa [#allocation3], 0  ;;  %s788_s0 = inlined_call_operand.vmem [shape: f32[16,8], index: 0, kind: input, shape index: {}]   ;;  %s789_s1 = inlined_call_operand.hbm [shape: f32[272,128], index: 1, kind: input, shape index: {}]   ;;  %s790_s2 = inlined_call_operand.hbm [shape: f32[2,8], index: 2, kind: output, shape index: {}]  }
   0x1   :  { %8 = vsyncpa [#allocation4], 0  ;;  %s718_s9 = smov [#allocation2]   ;;  %s670_s13 = scalar_lea.hbm %s789_s1, 4352 }
   0x2   :  { %s16_s10 = sshll.u32 %s718_s9, 4  ;;  %p671_p0 = scmp.ne.s32.totalorder %s789_s1, %s670_s13  ;;  %s17_s10 = int_to_ptr.vmem [resolvable:$true] %s16_s10 }
   0x3   :  { %p674_p1 = scmp.lt.u32.totalorder %s670_s13, %s789_s1 }
   0x5   :  { %p676_p2 = pnand %p674_p1, %p671_p0 }
   0x7   :  { %679 = shalt.err (!%p676_p2)
}
   0x8   :  { %s680_s18 = scalar_lea.vmem %s17_s10, 4352  ;;  %p685_p4 = scmp.lt.s32.totalorder %s17_s10, %s17_s10 }
   0x9   :  { %p681_p3 = scmp.ne.s32.totalorder %s17_s10, %s680_s18  ;;  %p686_p5 = scmp.lt.s32.totalorder %s680_s18, %s680_s18 }
   0xb   :  { %p687_p6 = por %p686_p5, %p685_p4 }
   0xd   :  { %p688_p7 = pnand %p687_p6, %p681_p3 }
   0xf   :  { %691 = shalt.err (!%p688_p7)
}
  0x10   :  { %s719_s19 = smov 128   ;;  %s720_s20 = smov 8  }
  0x11   :  { %22 = dma.hbm_to_vmem [thread:$0]  %s789_s1, 4352, %s17_s10, [#allocation3], %s719_s19, %s719_s19, %s720_s20  }
  0x12   :  { %714 = dma.done.wait [#allocation3], 4352  }
  0x13   :  { %715 = vsyncadd [#allocation3], 4294962944  ;;  %v721_v0 = vmov 0   ;;  %vm84_vm0 = vcmask 130048   ;;  %v26_v1 = vld [vmem:[%s788_s0] sm:$0xff]  ;;  %v27_v2 = vld [vmem:[%s788_s0 + $0x8] sm:$0xff] }
  0x14   :  { %668 = vset.pattern.permute.xlu0 %v721_v0  ;;  %669 = vset.pattern.permute.xlu1 %v721_v0  ;;  %v28_v3 = vld [vmem:[#allocation2] sm:$0xff]  ;;  %v628_v4 = vpack.c.bf16 %v27_v2, %v26_v1  ;;  %v29_v6 = vld [vmem:[#allocation2 + $0x8] sm:$0xff]  ;;  %v38_v7 = vld [vmem:[#allocation2 + $0x50] sm:$0xff]  ;;  %vm278_vm1 = vcmask 523264   ;;  %vm723_vm2 = vmmov 0   ;;  %s725_s0 = smov [#allocation5]  }
  0x15   :  { %569 = vmatprep.mubr.msk.f32.mxu0 %vm84_vm0, %v28_v3  ;;  %v36_v5 = vld [vmem:[#allocation2 + $0x40] sm:$0xff]  ;;  %v30_v8 = vld [vmem:[#allocation2 + $0x10] sm:$0xff]  ;;  %v37_v9 = vld [vmem:[#allocation2 + $0x48] sm:$0xff]  ;;  %56 = vperm.xlu1 %669, %v38_v7   ;;  %s504_s1 = sshll.u32 %s725_s0, 4  ;;  %vm496_vm3 = vcmask 58368   ;;  %s505_s1 = int_to_ptr.vmem [resolvable:$true] %s504_s1 }
  0x16   :  { %629 = vmatprep.subr.bf16.mxu0 %v628_v4  ;;  %46 = vperm.xlu0 %668, %v36_v5   ;;  %v39_v10 = vld [vmem:[#allocation2 + $0x58] sm:$0xff]  ;;  %v32_v12 = vld [vmem:[#allocation2 + $0x20] sm:$0xff]  ;;  %v41_v14 = vld [vmem:[#allocation2 + $0x68] sm:$0xff]  ;;  %s692_s27 = scalar_lea.vmem %s505_s1, 32  ;;  %p697_p9 = scmp.lt.s32.totalorder %s505_s1, %s505_s1 }
  0x17   :  { %631 = vmatpush3.bf16.msra.mxu0 %v628_v4  ;;  %v31_v11 = vld [vmem:[#allocation2 + $0x18] sm:$0xff]  ;;  %v40_v13 = vld [vmem:[#allocation2 + $0x60] sm:$0xff]  ;;  %v33_v15 = vld [vmem:[#allocation2 + $0x28] sm:$0xff]  ;;  %p693_p8 = scmp.ne.s32.totalorder %s505_s1, %s692_s27  ;;  %p698_p10 = scmp.lt.s32.totalorder %s692_s27, %s692_s27 }
  0x18   :  { %v34_v16 = vld [vmem:[#allocation2 + $0x30] sm:$0xff]  ;;  %v43_v18 = vld [vmem:[#allocation2 + $0x78] sm:$0xff]  ;;  %v230_v20 = vld [vmem:[#allocation2 + $0xc0] sm:$0xff] }
  0x19   :  { %61 = vperm.xlu1 %669, %v39_v10   ;;  %v42_v17 = vld [vmem:[#allocation2 + $0x70] sm:$0xff]  ;;  %v35_v19 = vld [vmem:[#allocation2 + $0x38] sm:$0xff]  ;;  %v231_v21 = vld [vmem:[#allocation2 + $0xc8] sm:$0xff]  ;;  %v724_v10 = vmov 0.0   ;;  %p699_p11 = por %p698_p10, %p697_p9 }
  0x1a   :  { %570 = vmatmul.mubr.msk.f32.vlgmr.msra.gmra.mrb[0].mxu0 %vm84_vm0, %v29_v6  ;;  %51 = vperm.xlu0 %668, %v37_v9   ;;  %v232_v22 = vld [vmem:[#allocation2 + $0xd0] sm:$0xff]  ;;  %v233_v23 = vld [vmem:[#allocation2 + $0xd8] sm:$0xff]  ;;  %v234_v24 = vld [vmem:[#allocation2 + $0xe0] sm:$0xff]  ;;  %v722_v9 = vmov 0.0|0.0  }
  0x1b   :  { %572 = vmatprep.mubr.msk.f32.mxu0 %vm84_vm0, %v30_v8  ;;  %v235_v25 = vld [vmem:[#allocation2 + $0xe8] sm:$0xff]  ;;  %v236_v26 = vld [vmem:[#allocation2 + $0xf0] sm:$0xff]  ;;  %v237_v27 = vld [vmem:[#allocation2 + $0xf8] sm:$0xff]  ;;  %648 = vmatprep.subr.bf16.mxu0 %v722_v9  ;;  %p700_p12 = pnand %p699_p11, %p693_p8 }
  0x1c   :  { %v417_v28 = vld [vmem:[#allocation2 + $0x108] sm:$0x3]  ;;  %v222_v29 = vld [vmem:[#allocation2 + $0x80] sm:$0xff]  ;;  %v224_v3 = vld [vmem:[#allocation2 + $0x90] sm:$0xff] }
  0x1d   :  { %71 = vperm.xlu1 %669, %v41_v14   ;;  %597 = vmatprep.mubr.msk.f32.mxu1 %vm278_vm1, %v222_v29  ;;  %v223_v2 = vld [vmem:[#allocation2 + $0x88] sm:$0xff]  ;;  %v225_v4 = vld [vmem:[#allocation2 + $0x98] sm:$0xff]  ;;  %v226_v5 = vld [vmem:[#allocation2 + $0xa0] sm:$0xff] }
  0x1e   :  { %573 = vmatmul.mubr.msk.f32.gmra.mrb[2].mxu0 %vm84_vm0, %v31_v11  ;;  %66 = vperm.xlu0 %668, %v40_v13   ;;  %v227_v6 = vld [vmem:[#allocation2 + $0xa8] sm:$0xff]  ;;  %v228_v7 = vld [vmem:[#allocation2 + $0xb0] sm:$0xff]  ;;  %v229_v8 = vld [vmem:[#allocation2 + $0xb8] sm:$0xff] }
  0x1f   :  { %575 = vmatprep.mubr.msk.f32.mxu0 %vm84_vm0, %v32_v12 }
  0x21   :  { %81 = vperm.xlu1 %669, %v43_v18  }
  0x22   :  { %576 = vmatmul.mubr.msk.f32.gmra.mrb[4].mxu0 %vm84_vm0, %v33_v15  ;;  %76 = vperm.xlu0 %668, %v42_v17  }
  0x23   :  { %578 = vmatprep.mubr.msk.f32.mxu0 %vm84_vm0, %v34_v16 }
  0x25   :  { %245 = vperm.xlu1 %669, %v231_v21  }
  0x26   :  { %579 = vmatmul.mubr.msk.f32.gmra.mrb[6].mxu0 %vm84_vm0, %v35_v19  ;;  %240 = vperm.xlu0 %668, %v230_v20  }
  0x27   :  { %625 = vmatprep.mubr.msk.f32.mxu0 %vm723_vm2, %v724_v10 }
  0x29   :  { %255 = vperm.xlu1 %669, %v233_v23  }
  0x2a   :  { %250 = vperm.xlu0 %668, %v232_v22  }
  0x2d   :  { %265 = vperm.xlu1 %669, %v235_v25  }
  0x2e   :  { %260 = vperm.xlu0 %668, %v234_v24  }
  0x31   :  { %275 = vperm.xlu1 %669, %v237_v27  }
  0x32   :  { %270 = vperm.xlu0 %668, %v236_v26  }
  0x36   :  { %420 = vperm.xlu0 %668, %v417_v28  }
  0x94   :  { %v57_v31 = vpop.permute.xlu1 %56 }
  0x95   :  { %v47_v30 = vpop.permute.xlu0 %46 }
  0x98   :  { %v62_v33 = vpop.permute.xlu1 %61 }
  0x99   :  { %v52_v32 = vpop.permute.xlu0 %51 }
  0x9c   :  { %v72_v43 = vpop.permute.xlu1 %71 }
  0x9d   :  { %v67_v46 = vpop.permute.xlu0 %66 }
  0xa0   :  { %v82_v55 = vpop.permute.xlu1 %81 }
  0xa1   :  { %v77_v58 = vpop.permute.xlu0 %76 }
  0xa4   :  { %v246_v11 = vpop.permute.xlu1 %245 }
  0xa5   :  { %v241_v12 = vpop.permute.xlu0 %240 }
  0xa8   :  { %v256_v13 = vpop.permute.xlu1 %255 }
  0xa9   :  { %v251_v15 = vpop.permute.xlu0 %250 }
  0xac   :  { %v266_v24 = vpop.permute.xlu1 %265 }
  0xad   :  { %v261_v27 = vpop.permute.xlu0 %260 }
  0xed   :  { %v571_v34 = vpop.f32.mrb[0].mxu0 }
  0xee   :  { %v181_v35 = vadd.f32 %v571_v34, %v52_v32  ;;  %v175_v36 = vpop.f32.mrb[1].mxu0 }
  0xef   :  { %v176_v37 = vadd.f32 %v175_v36, %v47_v30  ;;  %v276_v36 = vpop.permute.xlu1 %275 }
  0xf0   :  { %v215_v38 = vmax.f32 %v181_v35, 0.0 }
  0xf1   :  { %v214_v39 = vmax.f32 %v176_v37, 0.0  ;;  %v574_v40 = vpop.f32.mrb[2].mxu0 }
  0xf2   :  { %v191_v41 = vadd.f32 %v574_v40, %v62_v33  ;;  %v185_v42 = vpop.f32.mrb[3].mxu0 }
  0xf3   :  { %v186_v44 = vadd.f32 %v185_v42, %v57_v31  ;;  %v632_v45 = vpack.c.bf16 %v215_v38, %v214_v39  ;;  %v271_v39 = vpop.permute.xlu0 %270 }
  0xf4   :  { %v217_v47 = vmax.f32 %v191_v41, 0.0 }
  0xf5   :  { %v216_v48 = vmax.f32 %v186_v44, 0.0  ;;  %v577_v49 = vpop.f32.mrb[4].mxu0  ;;  %633 = vmatprep.subr.bf16.mxu1 %v632_v45 }
  0xf6   :  { %v201_v50 = vadd.f32 %v577_v49, %v72_v43  ;;  %v195_v51 = vpop.f32.mrb[5].mxu0  ;;  %635 = vmatpush3.bf16.msra.mxu1 %v632_v45 }
  0xf7   :  { %v636_v52 = vpack.c.bf16 %v217_v47, %v216_v48  ;;  %v196_v53 = vadd.f32 %v195_v51, %v67_v46  ;;  %v416_v47 = vld [vmem:[#allocation2 + $0x100] sm:$0x3]  ;;  %v421_v48 = vpop.permute.xlu0 %420 }
  0xf8   :  { %v219_v54 = vmax.f32 %v201_v50, 0.0 }
  0xf9   :  { %v218_v56 = vmax.f32 %v196_v53, 0.0  ;;  %v580_v57 = vpop.f32.mrb[6].mxu0  ;;  %637 = vmatprep.subr.bf16.mxu1 %v636_v52 }
  0xfa   :  { %v211_v59 = vadd.f32 %v580_v57, %v82_v55  ;;  %v205_v60 = vpop.f32.mrb[7].mxu0  ;;  %639 = vmatpush3.bf16.msra.mxu1 %v636_v52 }
  0xfb   :  { %v640_v61 = vpack.c.bf16 %v219_v54, %v218_v56  ;;  %v206_v62 = vadd.f32 %v205_v60, %v77_v58 }
  0xfc   :  { %v221_v63 = vmax.f32 %v211_v59, 0.0 }
  0xfd   :  { %v220_v0 = vmax.f32 %v206_v62, 0.0  ;;  %641 = vmatprep.subr.bf16.mxu1 %v640_v61 }
  0xfe   :  { %643 = vmatpush3.bf16.msra.mxu1 %v640_v61 }
  0xff   :  { %v644_v1 = vpack.c.bf16 %v221_v63, %v220_v0 }
 0x101   :  { %645 = vmatprep.subr.bf16.mxu1 %v644_v1 }
 0x102   :  { %647 = vmatpush3.bf16.msra.mxu1 %v644_v1 }
 0x105   :  { %598 = vmatmul.mubr.msk.f32.vlgmr.msra.gmra.mrb[0].mxu1 %vm278_vm1, %v223_v2 }
 0x106   :  { %600 = vmatprep.mubr.msk.f32.mxu1 %vm278_vm1, %v224_v3 }
 0x109   :  { %601 = vmatmul.mubr.msk.f32.gmra.mrb[2].mxu1 %vm278_vm1, %v225_v4 }
 0x10a   :  { %603 = vmatprep.mubr.msk.f32.mxu1 %vm278_vm1, %v226_v5 }
 0x10d   :  { %604 = vmatmul.mubr.msk.f32.gmra.mrb[4].mxu1 %vm278_vm1, %v227_v6 }
 0x10e   :  { %606 = vmatprep.mubr.msk.f32.mxu1 %vm278_vm1, %v228_v7 }
 0x111   :  { %607 = vmatmul.mubr.msk.f32.gmra.mrb[6].mxu1 %vm278_vm1, %v229_v8 }
 0x1d8   :  { %v599_v14 = vpop.f32.mrb[0].mxu1 }
 0x1d9   :  { %v375_v16 = vadd.f32 %v599_v14, %v246_v11  ;;  %v369_v17 = vpop.f32.mrb[1].mxu1 }
 0x1da   :  { %v370_v18 = vadd.f32 %v369_v17, %v241_v12 }
 0x1db   :  { %v409_v19 = vmax.f32 %v375_v16, 0.0 }
 0x1dc   :  { %v408_v20 = vmax.f32 %v370_v18, 0.0  ;;  %v602_v21 = vpop.f32.mrb[2].mxu1 }
 0x1dd   :  { %v385_v22 = vadd.f32 %v602_v21, %v256_v13  ;;  %v379_v23 = vpop.f32.mrb[3].mxu1 }
 0x1de   :  { %v649_v25 = vpack.c.bf16 %v409_v19, %v408_v20  ;;  %v380_v26 = vadd.f32 %v379_v23, %v251_v15 }
 0x1df   :  { %v411_v28 = vmax.f32 %v385_v22, 0.0 }
 0x1e0   :  { %v410_v29 = vmax.f32 %v380_v26, 0.0  ;;  %v605_v30 = vpop.f32.mrb[4].mxu1  ;;  %650 = vmatpush3.bf16.msra.mxu0 %v649_v25 }
 0x1e1   :  { %v395_v31 = vadd.f32 %v605_v30, %v266_v24  ;;  %v389_v32 = vpop.f32.mrb[5].mxu1  ;;  %651 = vmatprep.subr.bf16.mxu0 %v722_v9 }
 0x1e2   :  { %v652_v33 = vpack.c.bf16 %v411_v28, %v410_v29  ;;  %v390_v34 = vadd.f32 %v389_v32, %v261_v27 }
 0x1e3   :  { %v413_v35 = vmax.f32 %v395_v31, 0.0 }
 0x1e4   :  { %v412_v37 = vmax.f32 %v390_v34, 0.0  ;;  %v608_v38 = vpop.f32.mrb[6].mxu1  ;;  %653 = vmatpush3.bf16.msra.mxu0 %v652_v33 }
 0x1e5   :  { %v405_v40 = vadd.f32 %v608_v38, %v276_v36  ;;  %v399_v41 = vpop.f32.mrb[7].mxu1  ;;  %654 = vmatprep.subr.bf16.mxu0 %v722_v9 }
 0x1e6   :  { %v655_v42 = vpack.c.bf16 %v413_v35, %v412_v37  ;;  %v400_v43 = vadd.f32 %v399_v41, %v271_v39 }
 0x1e7   :  { %v415_v44 = vmax.f32 %v405_v40, 0.0 }
 0x1e8   :  { %v414_v45 = vmax.f32 %v400_v43, 0.0  ;;  %656 = vmatpush3.bf16.msra.mxu0 %v655_v42 }
 0x1e9   :  { %657 = vmatprep.subr.bf16.mxu0 %v722_v9 }
 0x1ea   :  { %v658_v46 = vpack.c.bf16 %v415_v44, %v414_v45 }
 0x1ec   :  { %659 = vmatpush3.bf16.msra.mxu0 %v658_v46 }
 0x1ef   :  { %626 = vmatmul.mubr.msk.f32.vlgmr.msra.gmra.mrb[8].mxu0 %vm278_vm1, %v416_v47 }
 0x2c2   :  { %v492_v49 = vpop.f32.mrb[8].mxu0 }
 0x2c3   :  { %v493_v50 = vadd.f32 %v492_v49, %v421_v48  ;;  %v627_v51 = vpop.f32.mrb[9].mxu0 }
 0x2c5   :  { %497 = vst.msk [vmem:[#allocation5] sm:$0x3] %vm496_vm3, %v493_v50 }
 0x2c6   :  { %703 = shalt.err (!%p700_p12)
}
 0x2c7   :  { %s704_s30 = scalar_lea.hbm %s790_s2, 32 }
 0x2c8   :  { %p705_p13 = scmp.ne.s32.totalorder %s790_s2, %s704_s30  ;;  %p708_p0 = scmp.lt.u32.totalorder %s704_s30, %s790_s2 }
 0x2ca   :  { %p710_p1 = pnand %p708_p0, %p705_p13 }
 0x2cc   :  { %713 = shalt.err (!%p710_p1)
}
 0x2cd   :  { %507 = dma.vmem_to_hbm [thread:$0]  %s505_s1, 32, %s790_s2, [#allocation4]  }
 0x2ce   :  { %716 = dma.done.wait [#allocation4], 32  }
 0x2cf   :  { %717 = vsyncadd [#allocation4], 4294967264 }
 0x2d0   :  { %511 = vsyncpa [#allocation3], 1 }
 0x2d1   :  { %512 = vsyncpa [#allocation4], 1 }

</bundles_post_ra>
